<compile_context>
chip_gen: v7x
topology: tpu7x:2x2x1
jax: 0.10.0
libtpu: 0.0.40
codegen_flags: <defaults>
</compile_context>

<pallas_src>
import functools

import jax
import jax.numpy as jnp
from jax.experimental import pallas as pl
from jax.experimental.pallas import tpu as pltpu


def _layer_norm(v, gamma, beta, eps):
    mean = jnp.mean(v, axis=-1, keepdims=True)
    c = v - mean
    var = jnp.mean(c * c, axis=-1, keepdims=True)
    return c * jax.lax.rsqrt(var + eps) * gamma + beta


def _mdr_kernel(x_ref, s_ref, wqkv_ref, wout_ref, g1_ref, b1_ref,
                w1_ref, bb1_ref, w2_ref, bb2_ref, g2_ref, b2_ref,
                o_ref, attn_ref, *, F, E, Q, head_num, att_dim, scaling, eps):
    block_b = x_ref.shape[0]
    rows = block_b * F
    cdt = wqkv_ref.dtype                      # matmul operand dtype (f32 or bf16)

    x2 = x_ref[...].reshape(rows, E)          # (rows, E) f32 — keep f32 for residual

    # Fused projection: columns = [Q query bases | key | value].
    proj = jnp.dot(x2.astype(cdt), wqkv_ref[...],
                   preferred_element_type=jnp.float32)      # (rows, (Q+2)*E)

    scores = s_ref[...]                       # (block_b, 1, Q) f32

    # Domain-mixed query: querys[b] = sum_q scores[b, q] * (x[b] @ W_Query_q)
    querys = None
    for qi in range(Q):
        base = proj[:, qi * E:(qi + 1) * E].reshape(block_b, F, E)
        w = scores[:, :, qi][:, :, None]      # (block_b, 1, 1)
        querys = base * w if querys is None else querys + base * w
    keys = proj[:, Q * E:(Q + 1) * E].reshape(block_b, F, E)
    values = proj[:, (Q + 1) * E:(Q + 2) * E].reshape(block_b, F, E)

    scale = (1.0 / (att_dim ** 0.5)) if scaling else 1.0

    # Per-head attention; head outputs go straight into a VMEM scratch slab.
    for h in range(head_num):
        lo = h * att_dim
        hi = lo + att_dim
        qh = querys[:, :, lo:hi]              # (block_b, F, d)
        kh = keys[:, :, lo:hi]
        vh = values[:, :, lo:hi]

        # (block_b, F, F): contract over d, batch over block_b (no explicit transpose)
        s = jax.lax.dot_general(qh.astype(cdt), kh.astype(cdt),
                                (((2,), (2,)), ((0,), (0,))),
                                preferred_element_type=jnp.float32)
        s = s * scale

        m = jnp.max(s, axis=-1, keepdims=True)
        p = jnp.exp(s - m)
        denom = jnp.sum(p, axis=-1, keepdims=True)
        p = p * pl.reciprocal(denom, approx=True)

        oh = jax.lax.dot_general(p.astype(cdt), vh.astype(cdt),
                                 (((2,), (1,)), ((0,), (0,))),
                                 preferred_element_type=jnp.float32)  # (block_b, F, d)
        attn_ref[:, lo:hi] = oh.reshape(rows, att_dim)

    attn = attn_ref[...]                      # (rows, E) f32

    # Out_linear (no bias) + residual + LayerNorm (eps=1e-6)
    res = jnp.dot(attn.astype(cdt), wout_ref[...],
                  preferred_element_type=jnp.float32) + x2
    res = _layer_norm(res, g1_ref[...], b1_ref[...], eps)

    # FFN: LayerNorm(res + fc2(relu(fc1(res))))
    hid = jnp.dot(res.astype(cdt), w1_ref[...],
                  preferred_element_type=jnp.float32) + bb1_ref[...]
    hid = jnp.maximum(hid, 0.0)
    ffn = jnp.dot(hid.astype(cdt), w2_ref[...],
                  preferred_element_type=jnp.float32) + bb2_ref[...]
    ffn = ffn + res
    out = _layer_norm(ffn, g2_ref[...], b2_ref[...], eps)

    o_ref[...] = out.reshape(block_b, F, E).astype(o_ref.dtype)


def _choose_block_b(B, F):
    # Target ~256 rows per grid step to fill the MXU M dimension, but keep at
    # least 2 parallel grid steps when the batch allows (v7x: 2 TensorCores).
    bb = max(1, min(B, 256 // max(F, 1)))
    while bb > 1 and B // bb < 2:
        bb -= 1
    while B % bb != 0:
        bb -= 1
    return bb


def mdr_transformer_layer(inputs, domain_ids, domain_attn_scores,
                          w_query_bases, w_key, w_value, w_out,
                          ln1_gamma, ln1_beta,
                          w_fc1, b_fc1, w_fc2, b_fc2,
                          ln2_gamma, ln2_beta,
                          *, head_num=2, scaling=True, eps=1e-6,
                          compute_dtype=jnp.float32, block_b=None):
    del domain_ids  # not used by the PyTorch forward() either
    B, F, E = inputs.shape
    Q = w_query_bases.shape[0]
    assert E % head_num == 0
    att_dim = E // head_num

    if block_b is None:
        block_b = _choose_block_b(B, F)
    assert B % block_b == 0

    # Fuse [Q query bases | W_key | W_Value] into one (E, (Q+2)E) weight slab.
    w_qkv = jnp.concatenate([w_query_bases[i] for i in range(Q)]
                            + [w_key, w_value], axis=1)

    cdt = compute_dtype
    w_qkv = w_qkv.astype(cdt)
    w_out_c = w_out.astype(cdt)
    w_fc1_c = w_fc1.astype(cdt)
    w_fc2_c = w_fc2.astype(cdt)

    f32 = jnp.float32
    x = inputs.astype(f32)
    scores3 = domain_attn_scores.astype(f32).reshape(B, 1, Q)
    g1 = ln1_gamma.astype(f32).reshape(1, E)
    b1 = ln1_beta.astype(f32).reshape(1, E)
    g2 = ln2_gamma.astype(f32).reshape(1, E)
    b2 = ln2_beta.astype(f32).reshape(1, E)
    bb1 = b_fc1.astype(f32).reshape(1, 2 * E)
    bb2 = b_fc2.astype(f32).reshape(1, E)

    kernel = functools.partial(
        _mdr_kernel, F=F, E=E, Q=Q, head_num=head_num, att_dim=att_dim,
        scaling=scaling, eps=eps)

    grid = (B // block_b,)
    const2 = lambda b: (0, 0)

    # Advisory cost estimate for XLA scheduling around the custom call.
    flops = int(2 * B * F * E * (Q + 2) * E      # fused projection
                + 2 * B * F * E * Q              # query mixing
                + 4 * B * F * F * E              # attention (QK^T + PV)
                + 2 * B * F * E * E              # Out_linear
                + 8 * B * F * E * E              # FFN
                + 12 * B * F * E)                # elementwise / layernorm
    transcendentals = int(B * head_num * F * F + B * head_num * F + 2 * B * F)
    weight_bytes = sum(int(a.size) * a.dtype.itemsize for a in
                       (w_qkv, w_out_c, w_fc1_c, w_fc2_c, g1, b1, g2, b2, bb1, bb2))
    bytes_accessed = int(2 * B * F * E * 4 + B * Q * 4 + weight_bytes)

    return pl.pallas_call(
        kernel,
        out_shape=jax.ShapeDtypeStruct((B, F, E), jnp.float32),
        grid_spec=pltpu.PrefetchScalarGridSpec(
            num_scalar_prefetch=0,
            grid=grid,
            in_specs=[
                pl.BlockSpec((block_b, F, E), lambda b: (b, 0, 0)),   # inputs
                pl.BlockSpec((block_b, 1, Q), lambda b: (b, 0, 0)),   # domain_attn_scores
                pl.BlockSpec((E, (Q + 2) * E), const2),               # fused [Qbases|K|V] slab
                pl.BlockSpec((E, E), const2),                         # Out_linear weight
                pl.BlockSpec((1, E), const2),                         # layer_norm gamma
                pl.BlockSpec((1, E), const2),                         # layer_norm beta
                pl.BlockSpec((E, 2 * E), const2),                     # fc1 weight
                pl.BlockSpec((1, 2 * E), const2),                     # fc1 bias
                pl.BlockSpec((2 * E, E), const2),                     # fc2 weight
                pl.BlockSpec((1, E), const2),                         # fc2 bias
                pl.BlockSpec((1, E), const2),                         # ffn_layer_norm gamma
                pl.BlockSpec((1, E), const2),                         # ffn_layer_norm beta
            ],
            out_specs=pl.BlockSpec((block_b, F, E), lambda b: (b, 0, 0)),
            scratch_shapes=[pltpu.VMEM((block_b * F, E), jnp.float32)],
        ),
        compiler_params=pltpu.CompilerParams(
            dimension_semantics=("parallel",)),
        cost_estimate=pl.CostEstimate(
            flops=flops, transcendentals=transcendentals,
            bytes_accessed=bytes_accessed),
    )(x, scores3, w_qkv, w_out_c, g1, b1, w_fc1_c, bb1, w_fc2_c, bb2, g2, b2)


def _reference(inputs, domain_attn_scores, w_query_bases, w_key, w_value,
               w_out, ln1_gamma, ln1_beta, w_fc1, b_fc1, w_fc2, b_fc2,
               ln2_gamma, ln2_beta, *, head_num=2, scaling=True, eps=1e-6):
    """Plain-JAX transcription of the PyTorch forward (dropout = identity)."""
    B, F, E = inputs.shape
    d = E // head_num

    def ln(v, g, b):
        mean = jnp.mean(v, axis=-1, keepdims=True)
        var = jnp.mean((v - mean) ** 2, axis=-1, keepdims=True)
        return (v - mean) / jnp.sqrt(var + eps) * g + b

    q_each = jnp.einsum('bfe,qeo->bfoq', inputs, w_query_bases)      # (B,F,E,Q)
    querys = jnp.einsum('bfoq,bq->bfo', q_each, domain_attn_scores)  # (B,F,E)
    keys = inputs @ w_key
    values = inputs @ w_value

    qs = jnp.stack(jnp.split(querys, head_num, axis=2))              # (H,B,F,d)
    ks = jnp.stack(jnp.split(keys, head_num, axis=2))
    vs = jnp.stack(jnp.split(values, head_num, axis=2))
    s = jnp.einsum('hbik,hbjk->hbij', qs, ks)
    if scaling:
        s = s / (d ** 0.5)
    p = jax.nn.softmax(s, axis=-1)
    r = jnp.matmul(p, vs)                                            # (H,B,F,d)
    r = jnp.concatenate([r[h] for h in range(head_num)], axis=-1)    # (B,F,E)
    r = r @ w_out
    r = r + inputs
    r = ln(r, ln1_gamma, ln1_beta)
    h = jax.nn.relu(r @ w_fc1 + b_fc1)
    h2 = h @ w_fc2 + b_fc2
    h2 = h2 + r
    return ln(h2, ln2_gamma, ln2_beta)


if __name__ == "__main__":
    # Small shapes consistent with the module: batch=2, fields=8, E=32, 2 heads,
    # 3 query bases, 4 domains.
    B, F, E = 2, 8, 32
    H, Q, NUM_DOMAINS = 2, 3, 4

    key = jax.random.PRNGKey(0)
    ks = jax.random.split(key, 16)
    std = 0.05  # matches nn.init.normal_(tensor, mean=0.0, std=0.05)

    x = jax.random.normal(ks[0], (B, F, E), dtype=jnp.float32)
    domain_ids = jax.random.randint(ks[1], (B,), 0, NUM_DOMAINS)  # unused by forward()
    domain_attn_scores = jax.nn.softmax(
        jax.random.normal(ks[2], (B, Q), dtype=jnp.float32), axis=-1)

    w_query_bases = std * jax.random.normal(ks[3], (Q, E, E), dtype=jnp.float32)
    w_key = std * jax.random.normal(ks[4], (E, E), dtype=jnp.float32)
    w_value = std * jax.random.normal(ks[5], (E, E), dtype=jnp.float32)
    # Linear weights in math orientation (in, out); PyTorch would pass W.T.
    w_out = std * jax.random.normal(ks[6], (E, E), dtype=jnp.float32)
    ln1_gamma = std * jax.random.normal(ks[7], (E,), dtype=jnp.float32)
    ln1_beta = std * jax.random.normal(ks[8], (E,), dtype=jnp.float32)
    w_fc1 = std * jax.random.normal(ks[9], (E, 2 * E), dtype=jnp.float32)
    b_fc1 = std * jax.random.normal(ks[10], (2 * E,), dtype=jnp.float32)
    w_fc2 = std * jax.random.normal(ks[11], (2 * E, E), dtype=jnp.float32)
    b_fc2 = std * jax.random.normal(ks[12], (E,), dtype=jnp.float32)
    ln2_gamma = std * jax.random.normal(ks[13], (E,), dtype=jnp.float32)
    ln2_beta = std * jax.random.normal(ks[14], (E,), dtype=jnp.float32)

    ref = _reference(x, domain_attn_scores, w_query_bases, w_key, w_value,
                     w_out, ln1_gamma, ln1_beta, w_fc1, b_fc1, w_fc2, b_fc2,
                     ln2_gamma, ln2_beta, head_num=H, scaling=True)

    # f32 MXU path (tight check)
    out = mdr_transformer_layer(
        x, domain_ids, domain_attn_scores, w_query_bases, w_key, w_value,
        w_out, ln1_gamma, ln1_beta, w_fc1, b_fc1, w_fc2, b_fc2,
        ln2_gamma, ln2_beta, head_num=H, scaling=True,
        compute_dtype=jnp.float32)
    out = jax.block_until_ready(out)
    assert out.shape == (B, F, E)
    assert jnp.allclose(out, ref, atol=2e-3, rtol=2e-3), "f32 kernel mismatch vs reference"

    # bf16 MXU operands / f32 accumulation path (looser check)
    out_bf16 = mdr_transformer_layer(
        x, domain_ids, domain_attn_scores, w_query_bases, w_key, w_value,
        w_out, ln1_gamma, ln1_beta, w_fc1, b_fc1, w_fc2, b_fc2,
        ln2_gamma, ln2_beta, head_num=H, scaling=True,
        compute_dtype=jnp.bfloat16)
    out_bf16 = jax.block_until_ready(out_bf16)
    assert jnp.allclose(out_bf16, ref, atol=5e-2, rtol=5e-2), "bf16 kernel mismatch vs reference"

    print("KERNEL_OK")
</pallas_src>

<mosaic_0001>
module attributes {stable_mosaic.version = 11 : i64} {
  func.func @_mdr_kernel(%arg0: i32, %arg1: memref<1x8x32xf32, #tpu.memory_space<vmem>>, %arg2: memref<1x1x3xf32, #tpu.memory_space<vmem>>, %arg3: memref<32x160xf32, #tpu.memory_space<vmem>>, %arg4: memref<32x32xf32, #tpu.memory_space<vmem>>, %arg5: memref<1x32xf32, #tpu.memory_space<vmem>>, %arg6: memref<1x32xf32, #tpu.memory_space<vmem>>, %arg7: memref<32x64xf32, #tpu.memory_space<vmem>>, %arg8: memref<1x64xf32, #tpu.memory_space<vmem>>, %arg9: memref<64x32xf32, #tpu.memory_space<vmem>>, %arg10: memref<1x32xf32, #tpu.memory_space<vmem>>, %arg11: memref<1x32xf32, #tpu.memory_space<vmem>>, %arg12: memref<1x32xf32, #tpu.memory_space<vmem>>, %arg13: memref<1x8x32xf32, #tpu.memory_space<vmem>>, %arg14: memref<8x32xf32, #tpu.memory_space<vmem>>) attributes {dimension_semantics = [#tpu.dimension_semantics<parallel>], iteration_bounds = array<i64: 2>, scalar_prefetch = 0 : i64, scratch_operands = 1 : i64, tpu.core_type = #tpu.core_type<tc>, window_params = [{transform_indices = @transform_0, window_bounds = array<i64: 1, 8, 32>}, {transform_indices = @transform_1, window_bounds = array<i64: 1, 1, 3>}, {pipeline_mode = #tpu.pipeline_mode<synchronous>, transform_indices = @transform_2, window_bounds = array<i64: 32, 160>}, {pipeline_mode = #tpu.pipeline_mode<synchronous>, transform_indices = @transform_3, window_bounds = array<i64: 32, 32>}, {pipeline_mode = #tpu.pipeline_mode<synchronous>, transform_indices = @transform_4, window_bounds = array<i64: 1, 32>}, {pipeline_mode = #tpu.pipeline_mode<synchronous>, transform_indices = @transform_5, window_bounds = array<i64: 1, 32>}, {pipeline_mode = #tpu.pipeline_mode<synchronous>, transform_indices = @transform_6, window_bounds = array<i64: 32, 64>}, {pipeline_mode = #tpu.pipeline_mode<synchronous>, transform_indices = @transform_7, window_bounds = array<i64: 1, 64>}, {pipeline_mode = #tpu.pipeline_mode<synchronous>, transform_indices = @transform_8, window_bounds = array<i64: 64, 32>}, {pipeline_mode = #tpu.pipeline_mode<synchronous>, transform_indices = @transform_9, window_bounds = array<i64: 1, 32>}, {pipeline_mode = #tpu.pipeline_mode<synchronous>, transform_indices = @transform_10, window_bounds = array<i64: 1, 32>}, {pipeline_mode = #tpu.pipeline_mode<synchronous>, transform_indices = @transform_11, window_bounds = array<i64: 1, 32>}, {transform_indices = @transform_12, window_bounds = array<i64: 1, 8, 32>}]} {
    %c0 = arith.constant 0 : index
    %c0_0 = arith.constant 0 : index
    %c0_1 = arith.constant 0 : index
    %0 = vector.load %arg1[%c0, %c0_0, %c0_1] : memref<1x8x32xf32, #tpu.memory_space<vmem>>, vector<1x8x32xf32>
    %1 = vector.shape_cast %0 : vector<1x8x32xf32> to vector<8x32xf32>
    %c0_2 = arith.constant 0 : index
    %c0_3 = arith.constant 0 : index
    %2 = vector.load %arg3[%c0_2, %c0_3] : memref<32x160xf32, #tpu.memory_space<vmem>>, vector<32x160xf32>
    %cst = arith.constant dense<0.000000e+00> : vector<8x160xf32>
    %3 = tpu.matmul %1, %2, %cst {dimension_numbers = #tpu.dot_dimension_numbers<[1], [0], [0], [1], [0, 0, 1, 1], [], []>} : vector<8x32xf32>, vector<32x160xf32>, vector<8x160xf32> -> vector<8x160xf32>
    %c0_4 = arith.constant 0 : index
    %c0_5 = arith.constant 0 : index
    %c0_6 = arith.constant 0 : index
    %4 = vector.load %arg2[%c0_4, %c0_5, %c0_6] : memref<1x1x3xf32, #tpu.memory_space<vmem>>, vector<1x1x3xf32>
    %5 = vector.extract_strided_slice %3 {offsets = [0, 0], sizes = [8, 32], strides = [1, 1]} : vector<8x160xf32> to vector<8x32xf32>
    %6 = vector.shape_cast %5 : vector<8x32xf32> to vector<1x8x32xf32>
    %7 = vector.extract_strided_slice %4 {offsets = [0, 0, 0], sizes = [1, 1, 1], strides = [1, 1, 1]} : vector<1x1x3xf32> to vector<1x1x1xf32>
    %8 = vector.shape_cast %7 : vector<1x1x1xf32> to vector<1x1xf32>
    %9 = vector.shape_cast %8 : vector<1x1xf32> to vector<1x1x1xf32>
    %10 = vector.broadcast %9 : vector<1x1x1xf32> to vector<1x8x32xf32>
    %11 = arith.mulf %6, %10 : vector<1x8x32xf32>
    %12 = vector.extract_strided_slice %3 {offsets = [0, 32], sizes = [8, 32], strides = [1, 1]} : vector<8x160xf32> to vector<8x32xf32>
    %13 = vector.shape_cast %12 : vector<8x32xf32> to vector<1x8x32xf32>
    %14 = vector.extract_strided_slice %4 {offsets = [0, 0, 1], sizes = [1, 1, 1], strides = [1, 1, 1]} : vector<1x1x3xf32> to vector<1x1x1xf32>
    %15 = vector.shape_cast %14 : vector<1x1x1xf32> to vector<1x1xf32>
    %16 = vector.shape_cast %15 : vector<1x1xf32> to vector<1x1x1xf32>
    %17 = vector.broadcast %16 : vector<1x1x1xf32> to vector<1x8x32xf32>
    %18 = arith.mulf %13, %17 : vector<1x8x32xf32>
    %19 = arith.addf %11, %18 : vector<1x8x32xf32>
    %20 = vector.extract_strided_slice %3 {offsets = [0, 64], sizes = [8, 32], strides = [1, 1]} : vector<8x160xf32> to vector<8x32xf32>
    %21 = vector.shape_cast %20 : vector<8x32xf32> to vector<1x8x32xf32>
    %22 = vector.extract_strided_slice %4 {offsets = [0, 0, 2], sizes = [1, 1, 1], strides = [1, 1, 1]} : vector<1x1x3xf32> to vector<1x1x1xf32>
    %23 = vector.shape_cast %22 : vector<1x1x1xf32> to vector<1x1xf32>
    %24 = vector.shape_cast %23 : vector<1x1xf32> to vector<1x1x1xf32>
    %25 = vector.broadcast %24 : vector<1x1x1xf32> to vector<1x8x32xf32>
    %26 = arith.mulf %21, %25 : vector<1x8x32xf32>
    %27 = arith.addf %19, %26 : vector<1x8x32xf32>
    %28 = vector.extract_strided_slice %3 {offsets = [0, 96], sizes = [8, 32], strides = [1, 1]} : vector<8x160xf32> to vector<8x32xf32>
    %29 = vector.shape_cast %28 : vector<8x32xf32> to vector<1x8x32xf32>
    %30 = vector.extract_strided_slice %3 {offsets = [0, 128], sizes = [8, 32], strides = [1, 1]} : vector<8x160xf32> to vector<8x32xf32>
    %31 = vector.shape_cast %30 : vector<8x32xf32> to vector<1x8x32xf32>
    %32 = vector.extract_strided_slice %27 {offsets = [0, 0, 0], sizes = [1, 8, 16], strides = [1, 1, 1]} : vector<1x8x32xf32> to vector<1x8x16xf32>
    %33 = vector.extract_strided_slice %29 {offsets = [0, 0, 0], sizes = [1, 8, 16], strides = [1, 1, 1]} : vector<1x8x32xf32> to vector<1x8x16xf32>
    %34 = vector.extract_strided_slice %31 {offsets = [0, 0, 0], sizes = [1, 8, 16], strides = [1, 1, 1]} : vector<1x8x32xf32> to vector<1x8x16xf32>
    %cst_7 = arith.constant dense<0.000000e+00> : vector<1x8x8xf32>
    %35 = tpu.matmul %32, %33, %cst_7 {dimension_numbers = #tpu.dot_dimension_numbers<[2], [2], [1], [1], [0, 0, 0, 1, 1, 1], [0], [0]>} : vector<1x8x16xf32>, vector<1x8x16xf32>, vector<1x8x8xf32> -> vector<1x8x8xf32>
    %cst_8 = arith.constant 2.500000e-01 : f32
    %36 = vector.broadcast %cst_8 : f32 to vector<1x8x8xf32>
    %37 = arith.mulf %35, %36 : vector<1x8x8xf32>
    %cst_9 = arith.constant dense<0xFF800000> : vector<1x8xf32>
    %38 = vector.multi_reduction <maximumf>, %37, %cst_9 [2] : vector<1x8x8xf32> to vector<1x8xf32>
    %39 = vector.shape_cast %38 : vector<1x8xf32> to vector<1x8x1xf32>
    %40 = vector.broadcast %39 : vector<1x8x1xf32> to vector<1x8x8xf32>
    %41 = arith.subf %37, %40 : vector<1x8x8xf32>
    %42 = math.exp %41 : vector<1x8x8xf32>
    %cst_10 = arith.constant dense<0.000000e+00> : vector<1x8xf32>
    %43 = vector.multi_reduction <add>, %42, %cst_10 [2] : vector<1x8x8xf32> to vector<1x8xf32>
    %44 = vector.shape_cast %43 : vector<1x8xf32> to vector<1x8x1xf32>
    %45 = tpu.reciprocal %44 {approx = true} : vector<1x8x1xf32> -> vector<1x8x1xf32>
    %46 = vector.broadcast %45 : vector<1x8x1xf32> to vector<1x8x8xf32>
    %47 = arith.mulf %42, %46 : vector<1x8x8xf32>
    %cst_11 = arith.constant dense<0.000000e+00> : vector<1x8x16xf32>
    %48 = tpu.matmul %47, %34, %cst_11 {dimension_numbers = #tpu.dot_dimension_numbers<[2], [1], [1], [2], [0, 0, 0, 1, 1, 2], [0], [0]>} : vector<1x8x8xf32>, vector<1x8x16xf32>, vector<1x8x16xf32> -> vector<1x8x16xf32>
    %49 = vector.shape_cast %48 : vector<1x8x16xf32> to vector<8x16xf32>
    %c0_12 = arith.constant 0 : index
    %c0_13 = arith.constant 0 : index
    %50 = vector.load %arg14[%c0_12, %c0_13] : memref<8x32xf32, #tpu.memory_space<vmem>>, vector<8x16xf32>
    tpu.vector_store %arg14[%c0_12, %c0_13], %49 {strides = array<i32>} : memref<8x32xf32, #tpu.memory_space<vmem>>, vector<8x16xf32>,
    %51 = vector.extract_strided_slice %27 {offsets = [0, 0, 16], sizes = [1, 8, 16], strides = [1, 1, 1]} : vector<1x8x32xf32> to vector<1x8x16xf32>
    %52 = vector.extract_strided_slice %29 {offsets = [0, 0, 16], sizes = [1, 8, 16], strides = [1, 1, 1]} : vector<1x8x32xf32> to vector<1x8x16xf32>
    %53 = vector.extract_strided_slice %31 {offsets = [0, 0, 16], sizes = [1, 8, 16], strides = [1, 1, 1]} : vector<1x8x32xf32> to vector<1x8x16xf32>
    %cst_14 = arith.constant dense<0.000000e+00> : vector<1x8x8xf32>
    %54 = tpu.matmul %51, %52, %cst_14 {dimension_numbers = #tpu.dot_dimension_numbers<[2], [2], [1], [1], [0, 0, 0, 1, 1, 1], [0], [0]>} : vector<1x8x16xf32>, vector<1x8x16xf32>, vector<1x8x8xf32> -> vector<1x8x8xf32>
    %cst_15 = arith.constant 2.500000e-01 : f32
    %55 = vector.broadcast %cst_15 : f32 to vector<1x8x8xf32>
    %56 = arith.mulf %54, %55 : vector<1x8x8xf32>
    %cst_16 = arith.constant dense<0xFF800000> : vector<1x8xf32>
    %57 = vector.multi_reduction <maximumf>, %56, %cst_16 [2] : vector<1x8x8xf32> to vector<1x8xf32>
    %58 = vector.shape_cast %57 : vector<1x8xf32> to vector<1x8x1xf32>
    %59 = vector.broadcast %58 : vector<1x8x1xf32> to vector<1x8x8xf32>
    %60 = arith.subf %56, %59 : vector<1x8x8xf32>
    %61 = math.exp %60 : vector<1x8x8xf32>
    %cst_17 = arith.constant dense<0.000000e+00> : vector<1x8xf32>
    %62 = vector.multi_reduction <add>, %61, %cst_17 [2] : vector<1x8x8xf32> to vector<1x8xf32>
    %63 = vector.shape_cast %62 : vector<1x8xf32> to vector<1x8x1xf32>
    %64 = tpu.reciprocal %63 {approx = true} : vector<1x8x1xf32> -> vector<1x8x1xf32>
    %65 = vector.broadcast %64 : vector<1x8x1xf32> to vector<1x8x8xf32>
    %66 = arith.mulf %61, %65 : vector<1x8x8xf32>
    %cst_18 = arith.constant dense<0.000000e+00> : vector<1x8x16xf32>
    %67 = tpu.matmul %66, %53, %cst_18 {dimension_numbers = #tpu.dot_dimension_numbers<[2], [1], [1], [2], [0, 0, 0, 1, 1, 2], [0], [0]>} : vector<1x8x8xf32>, vector<1x8x16xf32>, vector<1x8x16xf32> -> vector<1x8x16xf32>
    %68 = vector.shape_cast %67 : vector<1x8x16xf32> to vector<8x16xf32>
    %c0_19 = arith.constant 0 : index
    %c16 = arith.constant 16 : index
    %69 = vector.load %arg14[%c0_19, %c16] : memref<8x32xf32, #tpu.memory_space<vmem>>, vector<8x16xf32>
    tpu.vector_store %arg14[%c0_19, %c16], %68 {strides = array<i32>} : memref<8x32xf32, #tpu.memory_space<vmem>>, vector<8x16xf32>,
    %c0_20 = arith.constant 0 : index
    %c0_21 = arith.constant 0 : index
    %70 = vector.load %arg14[%c0_20, %c0_21] : memref<8x32xf32, #tpu.memory_space<vmem>>, vector<8x32xf32>
    %c0_22 = arith.constant 0 : index
    %c0_23 = arith.constant 0 : index
    %71 = vector.load %arg4[%c0_22, %c0_23] : memref<32x32xf32, #tpu.memory_space<vmem>>, vector<32x32xf32>
    %cst_24 = arith.constant dense<0.000000e+00> : vector<8x32xf32>
    %72 = tpu.matmul %70, %71, %cst_24 {dimension_numbers = #tpu.dot_dimension_numbers<[1], [0], [0], [1], [0, 0, 1, 1], [], []>} : vector<8x32xf32>, vector<32x32xf32>, vector<8x32xf32> -> vector<8x32xf32>
    %73 = arith.addf %72, %1 : vector<8x32xf32>
    %c0_25 = arith.constant 0 : index
    %c0_26 = arith.constant 0 : index
    %74 = vector.load %arg5[%c0_25, %c0_26] : memref<1x32xf32, #tpu.memory_space<vmem>>, vector<1x32xf32>
    %c0_27 = arith.constant 0 : index
    %c0_28 = arith.constant 0 : index
    %75 = vector.load %arg6[%c0_27, %c0_28] : memref<1x32xf32, #tpu.memory_space<vmem>>, vector<1x32xf32>
    %cst_29 = arith.constant dense<0.000000e+00> : vector<8xf32>
    %76 = vector.multi_reduction <add>, %73, %cst_29 [1] : vector<8x32xf32> to vector<8xf32>
    %77 = vector.shape_cast %76 : vector<8xf32> to vector<8x1xf32>
    %cst_30 = arith.constant 3.200000e+01 : f32
    %78 = vector.broadcast %cst_30 : f32 to vector<8x1xf32>
    %79 = arith.divf %77, %78 : vector<8x1xf32>
    %80 = vector.broadcast %79 : vector<8x1xf32> to vector<8x32xf32>
    %81 = arith.subf %73, %80 : vector<8x32xf32>
    %82 = arith.mulf %81, %81 : vector<8x32xf32>
    %cst_31 = arith.constant dense<0.000000e+00> : vector<8xf32>
    %83 = vector.multi_reduction <add>, %82, %cst_31 [1] : vector<8x32xf32> to vector<8xf32>
    %84 = vector.shape_cast %83 : vector<8xf32> to vector<8x1xf32>
    %cst_32 = arith.constant 3.200000e+01 : f32
    %85 = vector.broadcast %cst_32 : f32 to vector<8x1xf32>
    %86 = arith.divf %84, %85 : vector<8x1xf32>
    %cst_33 = arith.constant 9.99999997E-7 : f32
    %87 = vector.broadcast %cst_33 : f32 to vector<8x1xf32>
    %88 = arith.addf %86, %87 : vector<8x1xf32>
    %89 = math.rsqrt %88 : vector<8x1xf32>
    %90 = vector.broadcast %89 : vector<8x1xf32> to vector<8x32xf32>
    %91 = arith.mulf %81, %90 : vector<8x32xf32>
    %92 = vector.broadcast %74 : vector<1x32xf32> to vector<8x32xf32>
    %93 = arith.mulf %91, %92 : vector<8x32xf32>
    %94 = vector.broadcast %75 : vector<1x32xf32> to vector<8x32xf32>
    %95 = arith.addf %93, %94 : vector<8x32xf32>
    %c0_34 = arith.constant 0 : index
    %c0_35 = arith.constant 0 : index
    %96 = vector.load %arg7[%c0_34, %c0_35] : memref<32x64xf32, #tpu.memory_space<vmem>>, vector<32x64xf32>
    %cst_36 = arith.constant dense<0.000000e+00> : vector<8x64xf32>
    %97 = tpu.matmul %95, %96, %cst_36 {dimension_numbers = #tpu.dot_dimension_numbers<[1], [0], [0], [1], [0, 0, 1, 1], [], []>} : vector<8x32xf32>, vector<32x64xf32>, vector<8x64xf32> -> vector<8x64xf32>
    %c0_37 = arith.constant 0 : index
    %c0_38 = arith.constant 0 : index
    %98 = vector.load %arg8[%c0_37, %c0_38] : memref<1x64xf32, #tpu.memory_space<vmem>>, vector<1x64xf32>
    %99 = vector.broadcast %98 : vector<1x64xf32> to vector<8x64xf32>
    %100 = arith.addf %97, %99 : vector<8x64xf32>
    %cst_39 = arith.constant 0.000000e+00 : f32
    %101 = vector.broadcast %cst_39 : f32 to vector<8x64xf32>
    %102 = arith.maximumf %100, %101 : vector<8x64xf32>
    %c0_40 = arith.constant 0 : index
    %c0_41 = arith.constant 0 : index
    %103 = vector.load %arg9[%c0_40, %c0_41] : memref<64x32xf32, #tpu.memory_space<vmem>>, vector<64x32xf32>
    %cst_42 = arith.constant dense<0.000000e+00> : vector<8x32xf32>
    %104 = tpu.matmul %102, %103, %cst_42 {dimension_numbers = #tpu.dot_dimension_numbers<[1], [0], [0], [1], [0, 0, 1, 1], [], []>} : vector<8x64xf32>, vector<64x32xf32>, vector<8x32xf32> -> vector<8x32xf32>
    %c0_43 = arith.constant 0 : index
    %c0_44 = arith.constant 0 : index
    %105 = vector.load %arg10[%c0_43, %c0_44] : memref<1x32xf32, #tpu.memory_space<vmem>>, vector<1x32xf32>
    %106 = vector.broadcast %105 : vector<1x32xf32> to vector<8x32xf32>
    %107 = arith.addf %104, %106 : vector<8x32xf32>
    %108 = arith.addf %107, %95 : vector<8x32xf32>
    %c0_45 = arith.constant 0 : index
    %c0_46 = arith.constant 0 : index
    %109 = vector.load %arg11[%c0_45, %c0_46] : memref<1x32xf32, #tpu.memory_space<vmem>>, vector<1x32xf32>
    %c0_47 = arith.constant 0 : index
    %c0_48 = arith.constant 0 : index
    %110 = vector.load %arg12[%c0_47, %c0_48] : memref<1x32xf32, #tpu.memory_space<vmem>>, vector<1x32xf32>
    %cst_49 = arith.constant dense<0.000000e+00> : vector<8xf32>
    %111 = vector.multi_reduction <add>, %108, %cst_49 [1] : vector<8x32xf32> to vector<8xf32>
    %112 = vector.shape_cast %111 : vector<8xf32> to vector<8x1xf32>
    %cst_50 = arith.constant 3.200000e+01 : f32
    %113 = vector.broadcast %cst_50 : f32 to vector<8x1xf32>
    %114 = arith.divf %112, %113 : vector<8x1xf32>
    %115 = vector.broadcast %114 : vector<8x1xf32> to vector<8x32xf32>
    %116 = arith.subf %108, %115 : vector<8x32xf32>
    %117 = arith.mulf %116, %116 : vector<8x32xf32>
    %cst_51 = arith.constant dense<0.000000e+00> : vector<8xf32>
    %118 = vector.multi_reduction <add>, %117, %cst_51 [1] : vector<8x32xf32> to vector<8xf32>
    %119 = vector.shape_cast %118 : vector<8xf32> to vector<8x1xf32>
    %cst_52 = arith.constant 3.200000e+01 : f32
    %120 = vector.broadcast %cst_52 : f32 to vector<8x1xf32>
    %121 = arith.divf %119, %120 : vector<8x1xf32>
    %cst_53 = arith.constant 9.99999997E-7 : f32
    %122 = vector.broadcast %cst_53 : f32 to vector<8x1xf32>
    %123 = arith.addf %121, %122 : vector<8x1xf32>
    %124 = math.rsqrt %123 : vector<8x1xf32>
    %125 = vector.broadcast %124 : vector<8x1xf32> to vector<8x32xf32>
    %126 = arith.mulf %116, %125 : vector<8x32xf32>
    %127 = vector.broadcast %109 : vector<1x32xf32> to vector<8x32xf32>
    %128 = arith.mulf %126, %127 : vector<8x32xf32>
    %129 = vector.broadcast %110 : vector<1x32xf32> to vector<8x32xf32>
    %130 = arith.addf %128, %129 : vector<8x32xf32>
    %131 = vector.shape_cast %130 : vector<8x32xf32> to vector<1x8x32xf32>
    %c0_54 = arith.constant 0 : index
    %c0_55 = arith.constant 0 : index
    %c0_56 = arith.constant 0 : index
    %132 = vector.load %arg13[%c0_54, %c0_55, %c0_56] : memref<1x8x32xf32, #tpu.memory_space<vmem>>, vector<1x8x32xf32>
    tpu.vector_store %arg13[%c0_54, %c0_55, %c0_56], %131 {strides = array<i32>} : memref<1x8x32xf32, #tpu.memory_space<vmem>>, vector<1x8x32xf32>,
    return
  }
  func.func @transform_0(%arg0: i32) -> (i32, i32, i32) {
    %c0_i32 = arith.constant 0 : i32
    %c0_i32_0 = arith.constant 0 : i32
    %c0_i32_1 = arith.constant 0 : i32
    return %arg0, %c0_i32, %c0_i32_0 : i32, i32, i32
  }
  func.func @transform_1(%arg0: i32) -> (i32, i32, i32) {
    %c0_i32 = arith.constant 0 : i32
    %c0_i32_0 = arith.constant 0 : i32
    %c0_i32_1 = arith.constant 0 : i32
    return %arg0, %c0_i32, %c0_i32_0 : i32, i32, i32
  }
  func.func @transform_2(%arg0: i32) -> (i32, i32) {
    %c0_i32 = arith.constant 0 : i32
    %c0_i32_0 = arith.constant 0 : i32
    %c0_i32_1 = arith.constant 0 : i32
    return %c0_i32, %c0_i32_0 : i32, i32
  }
  func.func @transform_3(%arg0: i32) -> (i32, i32) {
    %c0_i32 = arith.constant 0 : i32
    %c0_i32_0 = arith.constant 0 : i32
    %c0_i32_1 = arith.constant 0 : i32
    return %c0_i32, %c0_i32_0 : i32, i32
  }
  func.func @transform_4(%arg0: i32) -> (i32, i32) {
    %c0_i32 = arith.constant 0 : i32
    %c0_i32_0 = arith.constant 0 : i32
    %c0_i32_1 = arith.constant 0 : i32
    return %c0_i32, %c0_i32_0 : i32, i32
  }
  func.func @transform_5(%arg0: i32) -> (i32, i32) {
    %c0_i32 = arith.constant 0 : i32
    %c0_i32_0 = arith.constant 0 : i32
    %c0_i32_1 = arith.constant 0 : i32
    return %c0_i32, %c0_i32_0 : i32, i32
  }
  func.func @transform_6(%arg0: i32) -> (i32, i32) {
    %c0_i32 = arith.constant 0 : i32
    %c0_i32_0 = arith.constant 0 : i32
    %c0_i32_1 = arith.constant 0 : i32
    return %c0_i32, %c0_i32_0 : i32, i32
  }
  func.func @transform_7(%arg0: i32) -> (i32, i32) {
    %c0_i32 = arith.constant 0 : i32
    %c0_i32_0 = arith.constant 0 : i32
    %c0_i32_1 = arith.constant 0 : i32
    return %c0_i32, %c0_i32_0 : i32, i32
  }
  func.func @transform_8(%arg0: i32) -> (i32, i32) {
    %c0_i32 = arith.constant 0 : i32
    %c0_i32_0 = arith.constant 0 : i32
    %c0_i32_1 = arith.constant 0 : i32
    return %c0_i32, %c0_i32_0 : i32, i32
  }
  func.func @transform_9(%arg0: i32) -> (i32, i32) {
    %c0_i32 = arith.constant 0 : i32
    %c0_i32_0 = arith.constant 0 : i32
    %c0_i32_1 = arith.constant 0 : i32
    return %c0_i32, %c0_i32_0 : i32, i32
  }
  func.func @transform_10(%arg0: i32) -> (i32, i32) {
    %c0_i32 = arith.constant 0 : i32
    %c0_i32_0 = arith.constant 0 : i32
    %c0_i32_1 = arith.constant 0 : i32
    return %c0_i32, %c0_i32_0 : i32, i32
  }
  func.func @transform_11(%arg0: i32) -> (i32, i32) {
    %c0_i32 = arith.constant 0 : i32
    %c0_i32_0 = arith.constant 0 : i32
    %c0_i32_1 = arith.constant 0 : i32
    return %c0_i32, %c0_i32_0 : i32, i32
  }
  func.func @transform_12(%arg0: i32) -> (i32, i32, i32) {
    %c0_i32 = arith.constant 0 : i32
    %c0_i32_0 = arith.constant 0 : i32
    %c0_i32_1 = arith.constant 0 : i32
    return %arg0, %c0_i32, %c0_i32_0 : i32, i32, i32
  }
}

</mosaic_0001>

<bundles_post_ra>
// kernel: tpu_custom_call.1
= control target key start
LH: loop header
LB: loop body
LE: loop exit
PB: predicated region body
PF: predicated region fallthrough
CT: control target
= control target key end

     0   :  { %s2105_s0 = inlined_call_operand.hbm [shape: f32[2,8,32], index: 0, kind: input, shape index: {}]   ;;  %s2106_s1 = inlined_call_operand.vmem [shape: f32[2,1,3], index: 1, kind: input, shape index: {}]   ;;  %s2107_s2 = inlined_call_operand.vmem [shape: f32[32,160], index: 2, kind: input, shape index: {}]   ;;  %s2108_s3 = inlined_call_operand.vmem [shape: f32[32,32], index: 3, kind: input, shape index: {}]   ;;  %s2109_s4 = inlined_call_operand.vmem [shape: f32[1,32], index: 4, kind: input, shape index: {}]   ;;  %s2110_s5 = inlined_call_operand.vmem [shape: f32[1,32], index: 5, kind: input, shape index: {}]   ;;  %s2111_s6 = inlined_call_operand.hbm [shape: f32[32,64], index: 6, kind: input, shape index: {}]   ;;  %s2112_s7 = inlined_call_operand.vmem [shape: f32[1,64], index: 7, kind: input, shape index: {}]   ;;  %s2113_s8 = inlined_call_operand.vmem [shape: f32[64,32], index: 8, kind: input, shape index: {}]   ;;  %s2114_s9 = inlined_call_operand.vmem [shape: f32[1,32], index: 9, kind: input, shape index: {}]   ;;  %s2115_s10 = inlined_call_operand.vmem [shape: f32[1,32], index: 10, kind: input, shape index: {}]   ;;  %s2116_s11 = inlined_call_operand.vmem [shape: f32[1,32], index: 11, kind: input, shape index: {}]   ;;  %s2117_s12 = inlined_call_operand.hbm [shape: f32[2,8,32], index: 12, kind: output, shape index: {}]  }
   0x1   :  { %2127 = sst [smem:[#allocation15_spill]] %s2116_s11 }
   0x2   :  { %2128 = sst [smem:[#allocation16_spill]] %s2117_s12 }
   0x3   :  { %17 = vsyncpa [#allocation4], 0 }
   0x4   :  { %19 = vsyncpa [#allocation4 + $0x1], 0 }
   0x5   :  { %20 = vsyncpa [#allocation7], 0 }
   0x6   :  { %21 = vsyncpa [#allocation5], 0 }
   0x7   :  { %23 = vsyncpa [#allocation5 + $0x1], 0  ;;  %s1775_s21 = smov 0   ;;  %s1777_s22 = smov 0  }
   0x8   :  { %s1779_s23 = smov 0   ;;  %s1781_s24 = smov 0  }
   0x9 LB: > { %2129 = sst [smem:[#allocation12_spill]] %s1680_s21  ;;  %s1796_s25 = sadd.s32 4294967295, %s1692_s24   ;;  %s1692_s24 = sphi %s1781_s24, %s2150_s24   ;;  %s1688_s23 = sphi %s1779_s23, %s2153_s23   ;;  %s1684_s22 = sphi %s1777_s22, %s2152_s22   ;;  %s1680_s21 = sphi %s1775_s21, %s2151_s21  }
   0xa   : > { %s1328_s26 = sadd.s32 4294967294, %s1692_s24   ;;  %p49_p0 = scmp.ne.s32.totalorder %s1684_s22, %s1680_s21 }
   0xb   : > { %p2122_p1 = scmp.eq.s32.totalorder %s1796_s25, 0  ;;  %p315_p3 = scmp.eq.s32.totalorder %s1328_s26, 1 }
   0xc   : > { %p1329_p5 = scmp.ge.s32.totalorder %s1692_s24, 1  ;;  %p322_p7 = scmp.lt.s32.totalorder %s1692_s24, 3 }
   0xd   : > { %p1805_p4 = por %p2122_p1, %p49_p0  ;;  %p1810_p6 = por %p315_p3, %p49_p0 }
   0xe   : > { %p1815_p8 = pnand %p1329_p5, %p322_p7  ;;  %s1694_s30 = smov [#allocation6]  }
   0xf   : > { %s2130_s27 = scalar_select %p1805_p4, 1, 0 }
  0x10   : > { %s2131_s28 = scalar_select %p1810_p6, 1, 0 }
  0x11   : > { %s2133_s29 = scalar_select %p1815_p8, 1, 0 }
  0x12   : > { %2132 = sst [smem:[#allocation13_spill]] %s2131_s28  ;;  %s346_s13 = sshll.u32 %s1694_s30, 4  ;;  %s1819_s13 = int_to_ptr.vmem [resolvable:$true] %s346_s13 }
  0x13   : > { %p1487_p9 = pneg %p1815_p8  ;;  %s1831_s15 = sadd.s32 1, %s1692_s24  }
  0x14   : > { %2135 = sst [smem:[#allocation14_spill]] %s1831_s15  ;;  %s36_s16 = sadd.s32 1, %s1688_s23 }
  0x15   : > { %p1826_p11 = pnand %p1487_p9, %p2122_p1  ;;  %s33_s17 = ssub.s32 %s1692_s24, %s1831_s15 }
  0x16   : > { %s1564_s20 = scalar_lea.hbm %s2111_s6, 512 }
  0x17   : > { %p1565_p12 = scmp.ne.s32.totalorder %s2111_s6, %s1564_s20  ;;  %p1566_p13 = pneg %p1826_p11 }
  0x18   : > { %p1571_p5 = scmp.lt.u32.totalorder %s1564_s20, %s2111_s6 }
  0x19   : > { %p1567_p0 = pnand %p1566_p13, %p1565_p12 }
  0x1b   : > { %p1568_p3 = pneg %p1567_p0 }
  0x1d   : > { %p1573_p7 = pnand %p1571_p5, %p1568_p3 }
  0x1f   : > { %1576 = shalt.err (!%p1573_p7)
}
  0x20   : > { %s1577_s15 = scalar_lea.vmem %s1819_s13, 512  ;;  %p1585_p2 = scmp.lt.s32.totalorder %s1819_s13, %s1819_s13 }
  0x21   : > { %p1578_p9 = scmp.ne.s32.totalorder %s1819_s13, %s1577_s15  ;;  %p1586_p6 = scmp.lt.s32.totalorder %s1577_s15, %s1577_s15 }
  0x23   : > { %p1580_p10 = pnand %p1578_p9, %p1566_p13  ;;  %p1587_p4 = por %p1586_p6, %p1585_p2 }
  0x25   : > { %p1581_p1 = pneg %p1580_p10 }
  0x27   : > { %p1588_p8 = pnand %p1587_p4, %p1581_p1 }
  0x29   : > { %1591 = shalt.err (!%p1588_p8)
}
  0x2a   : > { %s1695_s18 = smov 128   ;;  %s1696_s21 = smov 8  }
  0x2b   : > { %1490 = dma.hbm_to_vmem [thread:$0]  (!%p1826_p11), %s2111_s6, 512, %s1819_s13, [#allocation7], %s1695_s18, %s1695_s18, %s1696_s21  }
  0x2c   : > { %p34_p2 = scmp.eq.s32.totalorder %s33_s17, 0  ;;  %p43_p1 = scmp.ne.s32.totalorder %s1688_s23, %s1684_s22 }
  0x2d   : > { %p44_p4 = scmp.eq.s32.totalorder %s1692_s24, 0  ;;  %p1500_p6 = scmp.lt.s32.totalorder %s1692_s24, 2 }
  0x2e   : > { %s1862_s15 = scalar_select %p34_p2, %s1688_s23, %s36_s16  }
  0x2f   : > { %p45_p8 = por %p44_p4, %p43_p1  ;;  %p2136_p10 = scmp.eq.s32.totalorder %s1796_s25, 1 }
  0x30   : > { %s375_s26 = sand.u32 1, %s1688_s23   ;;  %s1333_s30 = sshll.u32 %s1692_s24, 7 }
  0x31   : > { %p1866_p12 = por %p2136_p10, %p43_p1  ;;  %s1332_s12 = sshll.u32 %s375_s26, 3 }
  0x32   : > { %s1875_s28 = scalar_lea.hbm %s2105_s0, %s1333_s30  ;;  %s379_s13 = scalar_lea.vmem [#allocation3], %s1332_s12 }
  0x33   : > { %s386_s16 = sshll.u32 %s379_s13, 4  ;;  %p1877_p11 = pnand %p1500_p6, %p45_p8  ;;  %s1881_s16 = int_to_ptr.vmem [resolvable:$true] %s386_s16 }
  0x34   : > { %s376_s18 = scalar_lea.sflag [#allocation4], %s375_s26  ;;  %s1592_s21 = scalar_lea.hbm %s1875_s28, 128 }
  0x35   : > { %p1593_p13 = scmp.ne.s32.totalorder %s1875_s28, %s1592_s21  ;;  %p1594_p0 = pneg %p1877_p11 }
  0x36   : > { %s1597_s19 = scalar_lea.hbm %s2105_s0, 256  ;;  %p1598_p7 = scmp.lt.u32.totalorder %s1875_s28, %s2105_s0 }
  0x37   : > { %p1595_p3 = pnand %p1594_p0, %p1593_p13  ;;  %p1599_p9 = scmp.lt.u32.totalorder %s1597_s19, %s1592_s21 }
  0x38   : > { %p1601_p1 = scmp.lt.u32.totalorder %s1592_s21, %s1875_s28 }
  0x39   : > { %p1596_p5 = pneg %p1595_p3  ;;  %p1600_p2 = por %p1599_p9, %p1598_p7 }
  0x3b   : > { %p1602_p4 = por %p1601_p1, %p1600_p2 }
  0x3d   : > { %p1603_p6 = pnand %p1602_p4, %p1596_p5 }
  0x3f   : > { %1606 = shalt.err (!%p1603_p6)
}
  0x40   : > { %s1607_s26 = scalar_lea.vmem %s1881_s16, 128  ;;  %s1697_s13 = smov [#allocation3]  }
  0x41   : > { %p1608_p8 = scmp.ne.s32.totalorder %s1881_s16, %s1607_s26  ;;  %s1612_s11 = sshll.u32 %s1697_s13, 4  ;;  %s1613_s11 = int_to_ptr.vmem [resolvable:$false] %s1612_s11 }
  0x42   : > { %s1614_s12 = scalar_lea.vmem %s1613_s11, 256  ;;  %p1615_p3 = scmp.lt.s32.totalorder %s1881_s16, %s1613_s11 }
  0x43   : > { %p1610_p10 = pnand %p1608_p8, %p1594_p0  ;;  %p1616_p7 = scmp.lt.s32.totalorder %s1614_s12, %s1607_s26 }
  0x45   : > { %p1611_p13 = pneg %p1610_p10  ;;  %p1617_p9 = por %p1616_p7, %p1615_p3 }
  0x47   : > { %p1618_p2 = pnand %p1617_p9, %p1611_p13 }
  0x49   : > { %1621 = shalt.err (!%p1618_p2)
}
  0x4a   : > { %1494 = dma.hbm_to_vmem [thread:$0]  (!%p1877_p11), %s1875_s28, 128, %s1881_s16, %s376_s18  }
  0x4b   : > { %p2139_p5 = scmp.ne.s32.totalorder %s2133_s29, 0 }
  0x4c   : > { %s1911_s21 = sand.u32 (!%p2139_p5), 1, %s1684_s22   ;;  %p2140_p0 = scmp.ne.s32.totalorder (!%p2139_p5), %s2130_s27, 0 }
  0x4d   : > { %401 = sbr.rel (%p2139_p5) target bundleno = 2698 (0xa8a), region = 68  ;;  %s2126_s19 = sshll.u32 (!%p2139_p5), %s1911_s21, 3 }
  0x4e   : > { %s404_s30 = scalar_lea.sflag (!%p2139_p5), [#allocation4], %s1911_s21  ;;  %s1917_s14 = scalar_lea.vmem (!%p2139_p5), [#allocation3], %s2126_s19 }
  0x54   : > { %1667 = dma.done.wait (%p2140_p0), %s404_s30, 128  }
  0x55   : > { %1669 = vsyncadd (%p2140_p0), %s404_s30, 4294967168  ;;  %p2141_p11 = scmp.eq.s32.totalorder %s1796_s25, 0 }
  0x57   : > { %1671 = dma.done.wait (%p2141_p11), [#allocation7], 512   ;;  %p2142_p1 = pmov %p2141_p11 }
  0x58   : > { %p455_p4 = scmp.lt.s32.totalorder %s1796_s25, 1  ;;  %v1698_v0 = vmov 0.0   ;;  %v1699_v1 = vmov 1   ;;  %v1700_v2 = vmov 0   ;;  %v460_v3 = vld [vmem:[%s2107_s2 + $0x8] sm:$0xff]  ;;  %v462_v4 = vld [vmem:[%s2107_s2 + $0x18] sm:$0xff] }
  0x59   : > { %1673 = vsyncadd (%p2142_p1), [#allocation7], 4294966784  ;;  %535 = vmatprep.mubr.f32.mxu1 %v1698_v0  ;;  %1549 = vset.pattern.permute.xlu0 %v1699_v1  ;;  %v459_v5 = vld [vmem:[%s2107_s2] sm:$0xff]  ;;  %v1447_v6 = vpack.c.bf16 %v462_v4, %v460_v3  ;;  %v461_v7 = vld [vmem:[%s2107_s2 + $0x10] sm:$0xff]  ;;  %vm467_vm0 = vcmask 261120   ;;  %v1701_v17 = vmov 2  }
  0x5a   : > { %1551 = vset.pattern.permute.xlu1 %v1700_v2  ;;  %1396 = vmatprep.subr.mxu0 %v1698_v0  ;;  %s456_s27 = scalar_select %p455_p4, %s1796_s25, 1  ;;  %v464_v8 = vld [vmem:[%s2107_s2 + $0x28] sm:$0xff]  ;;  %v466_v9 = vld [vmem:[%s2107_s2 + $0x38] sm:$0xff]  ;;  %v1449_v10 = vpack.c.bf16 %v461_v7, %v459_v5  ;;  %v463_v12 = vld [vmem:[%s2107_s2 + $0x20] sm:$0xff]  ;;  %vm1702_vm1 = vmmov 0   ;;  %vm576_vm2 = vcmask 130048  }
  0x5b   : > { %v1451_v11 = vpack.c.bf16 %v466_v9, %v464_v8  ;;  %v465_v13 = vld [vmem:[%s2107_s2 + $0x30] sm:$0xff]  ;;  %1448 = vmatprep.subr.bf16.mxu1 %v1447_v6  ;;  %1398 = vmatprep.mubr.msk.f32.mxu0 %vm1702_vm1, %v1698_v0  ;;  %s1703_s19 = smov 32   ;;  %s1705_s11 = smov 64   ;;  %vm653_vm3 = vcmask 64512   ;;  %v913_v60 = vld [vmem:[%s2108_s3] sm:$0xff]  ;;  %v914_v61 = vld [vmem:[%s2108_s3 + $0x8] sm:$0xff] }
  0x5c   : > { %s457_s12 = scalar_lea.vmem %s2106_s1, %s456_s27  ;;  %1450 = vmatpush1.bf16.msra.mxu1 %v1449_v10  ;;  %v1453_v15 = vpack.c.bf16 %v465_v13, %v463_v12  ;;  %v1959_v16 = vld [vmem:[%s1917_s14] sm:$0xff]  ;;  %s1704_s14 = smov 96   ;;  %v1456_v62 = vpack.c.bf16 %v914_v61, %v913_v60  ;;  %v916_v1 = vld [vmem:[%s2108_s3 + $0x18] sm:$0xff]  ;;  %v1708_v2 = vmov 0.0|0.0   ;;  %vm910_vm4 = vcmask 261248  }
  0x5d   : > { %v1339_v14 = vld [vmem:[%s457_s12] ss:$0 sm:$0xff]  ;;  %1452 = vmatprep.subr.bf16.mxu1 %v1451_v11  ;;  %s1706_s12 = smov 16   ;;  %s1707_s30 = smov 112   ;;  %v915_v63 = vld [vmem:[%s2108_s3 + $0x10] sm:$0xff]  ;;  %vm1120_vm5 = vcmask 523264  }
  0x5e   : > { %554 = vperm.xlu0 %1549, %v1339_v14   ;;  %549 = vperm.xlu1 %1551, %v1339_v14   ;;  %v1459_v3 = vpack.c.bf16 %v916_v1, %v915_v63  ;;  %v1353_v63 = vld [vmem:[%s2115_s10] ss:$0 sm:$0xff]  ;;  %s2145_s18 = sld [smem:[#allocation16_spill]]  ;;  %s1226_s27 = scalar_lea.sflag [#allocation5], %s1911_s21 }
  0x60   : > { %1454 = vmatpush1.bf16.msra.mxu1 %v1453_v15 }
  0x61   : > { %1386 = vmatprep.subr.mxu1 %v1698_v0 }
  0x62   : > { %1550 = vset.pattern.permute.xlu0 %v1701_v17 }
  0x63   : > { %564 = vperm.xlu0 %1550, %v1339_v14   ;;  %1338 = vmatmul.mubr.msk.f32.vlgmr.msra.gmra.mrb[0].mxu1 %vm467_vm0, %v1959_v16 }
  0x64   : > { %1388 = vmatprep.mubr.msk.f32.mxu1 %vm1702_vm1, %v1698_v0 }
  0xdd   : > { %v555_v18 = vpop.permute.xlu0 %554  ;;  %v550_v24 = vpop.permute.xlu1 %549 }
  0xe2   : > { %v565_v22 = vpop.permute.xlu0 %564 }
 0x136   : > { %v537_v19 = vpop.f32.mrb[0].mxu1 }
 0x137   : > { %574 = vrot.lane.b32.xlu0 %v537_v19, %s1703_s19  ;;  %v539_v20 = vpop.f32.mrb[1].mxu1  ;;  %v557_v21 = vmul.f32 %v555_v18, %v537_v19  ;;  %v567_v23 = vmul.f32 %v565_v22, %v537_v19  ;;  %v552_v27 = vmul.f32 %v550_v24, %v537_v19  ;;  %v1020_v18 = vld [vmem:[#allocation6] sm:$0xff]  ;;  %v1107_v24 = vld [vmem:[%s2113_s8 + $0x10] sm:$0xff] }
 0x139   : > { %559 = vrot.lane.b32.xlu1 %v557_v21, %s1704_s14  ;;  %v1022_v21 = vld [vmem:[#allocation6 + $0x10] sm:$0xff] }
 0x13d   : > { %569 = vrot.lane.b32.xlu1 %v567_v23, %s1705_s11  ;;  %v1106_v23 = vld [vmem:[%s2113_s8 + $0x8] sm:$0xff]  ;;  %s2143_s11 = sld [smem:[#allocation15_spill]] }
 0x141   : > { %741 = vrot.lane.b32.xlu1 %v537_v19, %s1706_s12  ;;  %v1021_v19 = vld [vmem:[#allocation6 + $0x8] sm:$0xff] }
 0x1a9   : > { %v575_v25 = vpop.permute.xlu0 %574 }
 0x1aa   : > { %1387 = vmatpush3.xpose.msk.msra.mxu1 %vm576_vm2, %v575_v25 }
 0x1ab   : > { %v560_v26 = vpop.permute.xlu1 %559  ;;  %1391 = vmatprep.subr.mxu1 %v1698_v0 }
 0x1ac   : > { %v562_v28 = vadd.f32 %v560_v26, %v552_v27  ;;  %v1108_v26 = vld [vmem:[%s2113_s8 + $0x18] sm:$0xff] }
 0x1ad   : > { %v1471_v27 = vpack.c.bf16 %v1108_v26, %v1107_v24 }
 0x1af   : > { %v570_v29 = vpop.permute.xlu1 %569 }
 0x1b0   : > { %v572_v30 = vadd.f32 %v570_v29, %v562_v28  ;;  %v1109_v28 = vld [vmem:[%s2113_s8 + $0x20] sm:$0xff]  ;;  %v1110_v29 = vld [vmem:[%s2113_s8 + $0x28] sm:$0xff] }
 0x1b2   : > { %739 = vrot.lane.b32.xlu0 %v572_v30, %s1707_s30  ;;  %1389 = vmatmul.mubr.msk.f32.vlgmr.msra.gmra.mrb[2].mxu1 %vm576_vm2, %v572_v30  ;;  %v1474_v30 = vpack.c.bf16 %v1110_v29, %v1109_v28 }
 0x1b3   : > { %1392 = vmatpush3.msra.mxu1 %v539_v20  ;;  %v742_v31 = vpop.permute.xlu1 %741  ;;  %1393 = vmatprep.mubr.msk.f32.mxu1 %vm1702_vm1, %v1698_v0 }
 0x1b4   : > { %1397 = vmatpush3.xpose.msk.msra.mxu0 %vm576_vm2, %v742_v31  ;;  %1401 = vmatprep.subr.mxu1 %v1698_v0 }
 0x1b5   : > { %1455 = vmatprep.subr.bf16.mxu0 %v1708_v2 }
 0x224   : > { %v740_v32 = vpop.permute.xlu0 %739 }
 0x225   : > { %1399 = vmatmul.mubr.msk.f32.vlgmr.msra.gmra.mrb[0].mxu0 %vm576_vm2, %v740_v32 }
 0x226   : > { %1414 = vmatprep.mubr.msk.f32.mxu0 %vm1702_vm1, %v1698_v0  ;;  %1457 = vmatpush3.bf16.msra.mxu0 %v1456_v62 }
 0x227   : > { %1458 = vmatprep.subr.bf16.mxu0 %v1708_v2 }
 0x22a   : > { %1460 = vmatpush3.bf16.msra.mxu0 %v1459_v3 }
 0x22b   : > { %1467 = vmatprep.subr.bf16.mxu0 %v1708_v2 }
 0x285   : > { %v648_v33 = vpop.f32.mrb[2].mxu1 }
 0x286   : > { %v652_v34 = vmul.f32 0.25, %v648_v33  ;;  %v1390_v35 = vpop.f32.mrb[3].mxu1 }
 0x287   : > { %v1347_v35 = vld [vmem:[%s2109_s4] ss:$0 sm:$0xff] }
 0x288   : > { %v654_v36 = vsel %vm653_vm3, %v652_v34, -inf }
 0x289   : > { %655 = vmax.xlane.f32.xlu1 %v654_v36 }
 0x2f8   : > { %v813_v37 = vpop.f32.mrb[0].mxu0 }
 0x2f9   : > { %v817_v38 = vmul.f32 0.25, %v813_v37  ;;  %v1400_v39 = vpop.f32.mrb[1].mxu0  ;;  %v1348_v37 = vld [vmem:[%s2110_s5] ss:$0 sm:$0xff] }
 0x2fb   : > { %v818_v40 = vsel %vm653_vm3, %v817_v38, -inf }
 0x2fc   : > { %819 = vmax.xlane.f32.xlu0 %v818_v40  ;;  %v1111_v40 = vld [vmem:[%s2113_s8 + $0x30] sm:$0xff] }
 0x316   : > { %v656_v41 = vpop.xlane.xlu1 %655 }
 0x317   : > { %v657_v42 = vsub.f32 %v652_v34, %v656_v41  ;;  %v1112_v41 = vld [vmem:[%s2113_s8 + $0x38] sm:$0xff] }
 0x319   : > { %v658_v43 = vmul.f32 1.442695, %v657_v42  ;;  %v1477_v42 = vpack.c.bf16 %v1112_v41, %v1111_v40 }
 0x31b   : > { %1552 = vpow2.f32 %v658_v43  ;;  %v1349_v43 = vld [vmem:[%s2112_s7] ss:$0 sm:$0xff] }
 0x325   : > { %v1553_v44 = vpop.eup %1552 }
 0x326   : > { %v660_v45 = vsel %vm653_vm3, %v1553_v44, 0.0 }
 0x327   : > { %661 = vadd.xlane.f32.xlu0 %v660_v45 }
 0x33d   : > { %830 = vrot.lane.b32.xlu0 %v539_v20, %s1707_s30  ;;  %v1462_v20 = vpack.c.bf16 %v1021_v19, %v1020_v18  ;;  %s2144_s30 = sshll.u32 %s1911_s21, 3 }
 0x33e   : > { %s454_s29 = scalar_lea.vmem [#allocation8], %s2144_s30 }
 0x33f   : > { %s1239_s28 = sshll.u32 %s454_s29, 4  ;;  %s2062_s28 = int_to_ptr.vmem [resolvable:$true] %s1239_s28 }
 0x340   : > { %s1622_s13 = scalar_lea.vmem %s2062_s28, 128 }
 0x341   : > { %p1623_p6 = scmp.ne.s32.totalorder %s2062_s28, %s1622_s13 }
 0x343   : > { %p1624_p8 = pnand %p1623_p6, %p1866_p12 }
 0x345   : > { %p1625_p10 = pneg %p1624_p8 }
 0x389   : > { %v820_v46 = vpop.xlane.xlu0 %819 }
 0x38a   : > { %v821_v47 = vsub.f32 %v817_v38, %v820_v46 }
 0x38c   : > { %v822_v48 = vmul.f32 1.442695, %v821_v47 }
 0x38e   : > { %1554 = vpow2.f32 %v822_v48  ;;  %v1351_v48 = vld [vmem:[%s2114_s9] ss:$0 sm:$0xff] }
 0x398   : > { %v1555_v49 = vpop.eup %1554 }
 0x399   : > { %v824_v50 = vsel %vm653_vm3, %v1555_v49, 0.0 }
 0x39a   : > { %825 = vadd.xlane.f32.xlu1 %v824_v50 }
 0x3b4   : > { %v662_v51 = vpop.xlane.xlu0 %661 }
 0x3b5   : > { %1556 = vrcp.f32 %v662_v51 }
 0x3b8   : > { %v831_v54 = vpop.permute.xlu0 %830 }
 0x3bf   : > { %v1557_v52 = vpop.eup %1556 }
 0x3c0   : > { %v664_v53 = vmul.f32 %v1557_v52, %v1553_v44 }
 0x3c2   : > { %1394 = vmatmul.mubr.msk.f32.vlgmr.msra.gmra.mrb[4].mxu1 %vm653_vm3, %v664_v53 }
 0x3c3   : > { %1402 = vmatpush3.msra.mxu1 %v831_v54  ;;  %1403 = vmatprep.mubr.msk.f32.mxu1 %vm1702_vm1, %v1698_v0 }
 0x3c4   : > { %1461 = vmatprep.subr.bf16.mxu1 %v1708_v2 }
 0x427   : > { %v826_v55 = vpop.xlane.xlu1 %825 }
 0x428   : > { %1558 = vrcp.f32 %v826_v55 }
 0x432   : > { %v1559_v56 = vpop.eup %1558 }
 0x433   : > { %v828_v57 = vmul.f32 %v1559_v56, %v1555_v49 }
 0x435   : > { %1404 = vmatmul.mubr.msk.f32.vlgmr.msra.gmra.mrb[6].mxu1 %vm653_vm3, %v828_v57 }
 0x436   : > { %1425 = vmatprep.mubr.msk.f32.mxu1 %vm1702_vm1, %v1698_v0  ;;  %1463 = vmatpush3.bf16.msra.mxu1 %v1462_v20 }
 0x437   : > { %1464 = vmatprep.subr.bf16.mxu1 %v1708_v2 }
 0x495   : > { %v734_v58 = vpop.f32.mrb[4].mxu1 }
 0x496   : > { %738 = vst.msk [vmem:[#allocation2] sm:$0xff] %vm576_vm2, %v734_v58  ;;  %v1395_v59 = vpop.f32.mrb[5].mxu1 }
 0x508   : > { %v902_v4 = vpop.f32.mrb[6].mxu1 }
 0x509   : > { %907 = vrot.lane.b32.xlu1 %v902_v4, %s1706_s12  ;;  %v1405_v5 = vpop.f32.mrb[7].mxu1  ;;  %s1356_s12 = sshll.u32 %s1796_s25, 7  ;;  %s1709_s25 = smov [#allocation8]  }
 0x50a   : > { %s2060_s26 = scalar_lea.hbm %s2145_s18, %s1356_s12  ;;  %s1626_s19 = sshll.u32 %s1709_s25, 4  ;;  %s1627_s19 = int_to_ptr.vmem [resolvable:$false] %s1626_s19 }
 0x50b   : > { %s1628_s14 = scalar_lea.vmem %s1627_s19, 256  ;;  %p1629_p13 = scmp.lt.s32.totalorder %s2062_s28, %s1627_s19 }
 0x50c   : > { %p1630_p3 = scmp.lt.s32.totalorder %s1628_s14, %s1622_s13 }
 0x50e   : > { %p1631_p7 = por %p1630_p3, %p1629_p13 }
 0x510   : > { %p1632_p9 = pnand %p1631_p7, %p1625_p10 }
 0x57b   : > { %v908_v6 = vpop.permute.xlu1 %907 }
 0x57c   : > { %911 = vst.msk [vmem:[#allocation2] sm:$0xff] %vm910_vm4, %v908_v6 }
 0x583   : > { %v912_v7 = vld [vmem:[#allocation2] sm:$0xff] }
 0x584   : > { %1415 = vmatmul.mubr.msk.f32.vlgmr.msra.gmra.mrb[2].mxu0 %vm467_vm0, %v912_v7 }
 0x585   : > { %1444 = vmatprep.mubr.msk.f32.mxu0 %vm1702_vm1, %v1698_v0  ;;  %v1023_v0 = vld [vmem:[#allocation6 + $0x18] sm:$0xff] }
 0x586   : > { %v1465_v22 = vpack.c.bf16 %v1023_v0, %v1022_v21 }
 0x588   : > { %1466 = vmatpush3.bf16.msra.mxu1 %v1465_v22 }
 0x657   : > { %v986_v8 = vpop.f32.mrb[2].mxu0 }
 0x658   : > { %v987_v9 = vadd.f32 %v986_v8, %v1959_v16  ;;  %v1416_v10 = vpop.f32.mrb[3].mxu0  ;;  %v1105_v16 = vld [vmem:[%s2113_s8] sm:$0xff] }
 0x659   : > { %v1468_v25 = vpack.c.bf16 %v1106_v23, %v1105_v16 }
 0x65a   : > { %v992_v11 = vsel %vm467_vm0, %v987_v9, 0.0 }
 0x65b   : > { %993 = vadd.xlane.f32.xlu1 %v992_v11  ;;  %1469 = vmatpush3.bf16.msra.mxu0 %v1468_v25 }
 0x65c   : > { %1470 = vmatprep.subr.bf16.mxu0 %v1708_v2 }
 0x65f   : > { %1472 = vmatpush3.bf16.msra.mxu0 %v1471_v27 }
 0x660   : > { %1473 = vmatprep.subr.bf16.mxu0 %v1708_v2 }
 0x663   : > { %1475 = vmatpush3.bf16.msra.mxu0 %v1474_v30 }
 0x664   : > { %1476 = vmatprep.subr.bf16.mxu0 %v1708_v2  ;;  %v1354_v2 = vld [vmem:[%s2143_s11] ss:$0 sm:$0xff] }
 0x667   : > { %1478 = vmatpush3.bf16.msra.mxu0 %v1477_v42 }
 0x6e8   : > { %v994_v12 = vpop.xlane.xlu1 %993 }
 0x6e9   : > { %v996_v13 = vmul.f32 0.03125, %v994_v12 }
 0x6eb   : > { %v997_v14 = vsub.f32 %v987_v9, %v996_v13 }
 0x6ed   : > { %v998_v15 = vmul.f32 %v997_v14, %v997_v14 }
 0x6ef   : > { %v999_v17 = vsel %vm467_vm0, %v998_v15, 0.0 }
 0x6f0   : > { %1000 = vadd.xlane.f32.xlu0 %v999_v17 }
 0x77d   : > { %v1001_v31 = vpop.xlane.xlu0 %1000 }
 0x77e   : > { %v1002_v32 = vmul.f32 0.03125, %v1001_v31 }
 0x780   : > { %v1003_v33 = vadd.f32 1e-06, %v1002_v32 }
 0x782   : > { %1560 = vrsqrt.f32 %v1003_v33 }
 0x78c   : > { %v1561_v34 = vpop.eup %1560 }
 0x78d   : > { %v1005_v36 = vmul.f32 %v1561_v34, %v997_v14 }
 0x78f   : > { %v1012_v38 = vmul.f32 %v1347_v35, %v1005_v36 }
 0x791   : > { %v1019_v39 = vadd.f32 %v1348_v37, %v1012_v38 }
 0x793   : > { %1426 = vmatmul.mubr.msk.f32.vlgmr.msra.gmra.mrb[8].mxu1 %vm467_vm0, %v1019_v39 }
 0x866   : > { %v1100_v44 = vpop.f32.mrb[8].mxu1 }
 0x867   : > { %v1101_v45 = vadd.f32 %v1349_v43, %v1100_v44  ;;  %v1427_v46 = vpop.f32.mrb[9].mxu1 }
 0x869   : > { %v1104_v47 = vmax.f32 %v1101_v45, 0.0 }
 0x86b   : > { %1445 = vmatmul.mubr.msk.f32.vlgmr.msra.gmra.mrb[4].mxu0 %vm1120_vm5, %v1104_v47 }
 0x93e   : > { %v1190_v49 = vpop.f32.mrb[4].mxu0 }
 0x93f   : > { %v1191_v50 = vadd.f32 %v1351_v48, %v1190_v49  ;;  %v1446_v51 = vpop.f32.mrb[5].mxu0 }
 0x941   : > { %v1194_v52 = vadd.f32 %v1191_v50, %v1019_v39 }
 0x943   : > { %v1197_v53 = vsel %vm467_vm0, %v1194_v52, 0.0 }
 0x944   : > { %1198 = vadd.xlane.f32.xlu0 %v1197_v53 }
 0x9d1   : > { %v1199_v54 = vpop.xlane.xlu0 %1198 }
 0x9d2   : > { %v1200_v55 = vmul.f32 0.03125, %v1199_v54 }
 0x9d4   : > { %v1201_v56 = vsub.f32 %v1194_v52, %v1200_v55 }
 0x9d6   : > { %v1202_v57 = vmul.f32 %v1201_v56, %v1201_v56 }
 0x9d8   : > { %v1203_v58 = vsel %vm467_vm0, %v1202_v57, 0.0 }
 0x9d9   : > { %1204 = vadd.xlane.f32.xlu1 %v1203_v58 }
 0xa66   : > { %v1205_v59 = vpop.xlane.xlu1 %1204 }
 0xa67   : > { %v1206_v60 = vmul.f32 0.03125, %v1205_v59 }
 0xa69   : > { %v1207_v61 = vadd.f32 1e-06, %v1206_v60 }
 0xa6b   : > { %1562 = vrsqrt.f32 %v1207_v61 }
 0xa75   : > { %v1563_v62 = vpop.eup %1562 }
 0xa76   : > { %v1209_v1 = vmul.f32 %v1563_v62, %v1201_v56 }
 0xa78   : > { %v1216_v3 = vmul.f32 %v1353_v63, %v1209_v1 }
 0xa7a   : > { %v1223_v4 = vadd.f32 %v1354_v2, %v1216_v3 }
 0xa7c   : > { %1224 = vst.msk [vmem:[%s454_s29] sm:$0xff] %vm467_vm0, %v1223_v4 }
 0xa7d   : > { %1635 = shalt.err (!%p1632_p9)
}
 0xa7e   : > { %s1636_s21 = scalar_lea.hbm %s2060_s26, 128  ;;  %s1640_s30 = scalar_lea.hbm %s2145_s18, 256 }
 0xa7f   : > { %p1637_p2 = scmp.ne.s32.totalorder %s2060_s26, %s1636_s21  ;;  %p1641_p11 = scmp.lt.u32.totalorder %s2060_s26, %s2145_s18 }
 0xa80   : > { %p1642_p1 = scmp.lt.u32.totalorder %s1640_s30, %s1636_s21  ;;  %p1644_p6 = scmp.lt.u32.totalorder %s1636_s21, %s2060_s26 }
 0xa81   : > { %p1638_p5 = pnand %p1637_p2, %p1866_p12 }
 0xa82   : > { %p1643_p4 = por %p1642_p1, %p1641_p11 }
 0xa83   : > { %p1639_p0 = pneg %p1638_p5 }
 0xa84   : > { %p1645_p8 = por %p1644_p6, %p1643_p4 }
 0xa86   : > { %p1646_p10 = pnand %p1645_p8, %p1639_p0 }
 0xa88   : > { %1649 = shalt.err (!%p1646_p10)
}
 0xa89   : > { %1485 = dma.vmem_to_hbm [thread:$0]  (%p1866_p12), %s2062_s28, 128, %s2060_s26, %s1226_s27  }
 0xa8a PF: > { %s2146_s17 = sld [smem:[#allocation12_spill]]  ;;  %s2147_s13 = sld [smem:[#allocation13_spill]] }
 0xa8b   : > { %p2149_p3 = scmp.ge.s32.totalorder %s1692_s24, 2 }
 0xa90   : > { %s1251_s25 = sand.u32 1, %s2146_s17   ;;  %p2148_p13 = scmp.ne.s32.totalorder %s2147_s13, 0 }
 0xa91   : > { %s1252_s19 = scalar_lea.sflag [#allocation5], %s1251_s25 }
 0xa92   : > { %p1496_p7 = pnand %p2149_p3, %p2148_p13 }
 0xa94   : > { %1675 = dma.done.wait (!%p1496_p7), %s1252_s19, 128  }
 0xa95   : > { %1677 = vsyncadd (!%p1496_p7), %s1252_s19, 4294967168  ;;  %s2150_s24 = sld [smem:[#allocation14_spill]]  ;;  %s2151_s21 = smov %s1684_s22 }
 0xa96   : > { %s2152_s22 = smov %s1688_s23  ;;  %s2153_s23 = smov %s1862_s15 }
 0xa9b   : > { %p26_p9 = scmp.ge.s32.totalorder %s2150_s24, 4  }
 0xa9d   :  { %28 = sbr.rel (!%p26_p9) target bundleno = 9 (0x9), region = 120 }
 0xaa4   :  { %1257 = vsyncpa [#allocation4], 1 }
 0xaa5   :  { %1259 = vsyncpa [#allocation4 + $0x1], 1 }
 0xaa6   :  { %1260 = vsyncpa [#allocation7], 1 }
 0xaa7   :  { %1261 = vsyncpa [#allocation5], 1 }
 0xaa8   :  { %1263 = vsyncpa [#allocation5 + $0x1], 1 }

</bundles_post_ra>
